<compile_context>
chip_gen: v7x
topology: tpu7x:2x2x1
jax: 0.10.0
libtpu: 0.0.40
codegen_flags: <defaults>
</compile_context>

<pallas_src>
from itertools import accumulate
from typing import NamedTuple, Tuple

import jax
import jax.numpy as jnp
from jax.experimental import pallas as pl
from jax.experimental.pallas import tpu as pltpu


def get_windows_linear(windows: int, count: list):
    """Identical logic to the PyTorch helper."""
    sum_ls = []
    n = len(count)
    start = 0
    while start < n:
        end = min(start + windows, n)
        sum_ls.append(sum(count[start:end]))
        start = end
    base_output_dim = 4096 // len(sum_ls)
    remainder = 4096 % len(sum_ls)
    output_dim_ls = [
        base_output_dim + (1 if i < remainder else 0) for i in range(len(sum_ls))
    ]
    return sum_ls, output_dim_ls


def _round_up(x: int, m: int) -> int:
    return ((x + m - 1) // m) * m


class VELowerParams(NamedTuple):
    w_bd: jax.Array            # (D_in, D_out) block-diagonal weight
    b_cat: jax.Array           # (1, D_out) concatenated bias
    in_dims: Tuple[int, ...]
    out_dims: Tuple[int, ...]


def build_ve_lower_params(weights, biases, dtype=jnp.float32) -> VELowerParams:
    """Build the fused block-diagonal weight + concatenated bias ONCE (init time).

    weights[i]: (in_dims[i], out_dims[i])  (i.e. nn.Linear.weight.T)
    biases[i]:  (1, out_dims[i]) or (out_dims[i],)
    """
    in_dims = [int(w.shape[0]) for w in weights]
    out_dims = [int(w.shape[1]) for w in weights]
    d_in, d_out = sum(in_dims), sum(out_dims)
    w_bd = jnp.zeros((d_in, d_out), dtype=dtype)
    io = oo = 0
    for w in weights:
        w_bd = w_bd.at[io:io + w.shape[0], oo:oo + w.shape[1]].set(w.astype(dtype))
        io += int(w.shape[0])
        oo += int(w.shape[1])
    b_cat = jnp.concatenate(
        [jnp.reshape(b, (1, -1)) for b in biases], axis=-1
    ).astype(dtype)
    return VELowerParams(w_bd, b_cat, tuple(in_dims), tuple(out_dims))


def _ve_lower_kernel(x_ref, w_ref, b_ref, o_ref):
    """One fused block-diagonal matmul: (tm, D_in) @ (D_in, D_out) + bias,
    followed by a single lane-dense full-width store."""
    y = jnp.dot(x_ref[...], w_ref[...], preferred_element_type=jnp.float32)
    o_ref[...] = (y + b_ref[...]).astype(o_ref.dtype)


def _choose_row_tile(M: int, tm: int) -> int:
    """Pick the row tile.

    * M <= 256: one tile (too little work to split; block == full extent).
    * 256 < M <= tm: split into >=2 tiles (multiple of 256) so the "parallel"
      grid axis shards across both TensorCores on v7x.
    * M > tm: use the requested tile (grid >= 2 automatically).
    """
    if M <= 256:
        return M
    if M <= tm:
        return max(256, _round_up((M + 1) // 2, 256))
    return tm


def ve_lower_branch_embedding(x, params: VELowerParams, *, tm=512,
                              out_dtype=jnp.float32):
    """x: (B, S, D_in) -> (B, S, D_out).

    out_dtype defaults to float32 (matches nn.Linear output semantics).
    Fast path: out_dtype=jnp.bfloat16 halves the dominant writeback traffic.
    """
    B, S, D_in = x.shape
    w_bd, b_cat = params.w_bd, params.b_cat
    assert sum(params.in_dims) == D_in, (params.in_dims, D_in)
    D_out = int(w_bd.shape[1])
    M = B * S
    x2 = x.reshape(M, D_in)

    tm_eff = _choose_row_tile(M, tm)
    grid = (pl.cdiv(M, tm_eff),)

    x_bytes = jnp.dtype(x.dtype).itemsize
    w_bytes = jnp.dtype(w_bd.dtype).itemsize
    out_bytes = jnp.dtype(out_dtype).itemsize

    # True FLOPs (block-diagonal zeros excluded) so XLA's scheduler gets an
    # accurate hint.
    true_flops = 2 * M * sum(i * o for i, o in zip(params.in_dims, params.out_dims))
    cost = pl.CostEstimate(
        flops=true_flops,
        transcendentals=0,
        bytes_accessed=(M * D_in * x_bytes
                        + M * D_out * out_bytes
                        + w_bd.size * w_bytes
                        + b_cat.size * w_bytes),
    )

    # Weight has a constant block index across the grid; single-buffer it once
    # it is big enough to compete with the output tile for VMEM (matters on
    # v7x's 64 MiB VMEM).  Below the threshold keep the default pipelining.
    single_buffer_w = (D_in * D_out * w_bytes) >= (4 << 20)
    if single_buffer_w:
        w_spec = pl.BlockSpec((D_in, D_out), lambda m: (0, 0),
                              pipeline_mode=pl.Buffered(1))
    else:
        w_spec = pl.BlockSpec((D_in, D_out), lambda m: (0, 0))
    b_spec = pl.BlockSpec((1, D_out), lambda m: (0, 0))

    # Scoped-VMEM budget for this tiling (x + out double-buffered, weight
    # single/double, bias padded to 8 sublanes), plus slack.  v5e's default is
    # only 16 MiB, so tm=512 f32 needs this raised; stay well under the 64 MiB
    # physical VMEM of v7x.
    w_bufs = 1 if single_buffer_w else 2
    vmem_need = (2 * tm_eff * D_in * x_bytes
                 + 2 * tm_eff * D_out * out_bytes
                 + w_bufs * D_in * D_out * w_bytes
                 + 2 * 8 * D_out * w_bytes)
    vmem_limit = int(min(max(vmem_need + (4 << 20), 16 << 20), 40 << 20))

    out = pl.pallas_call(
        _ve_lower_kernel,
        out_shape=jax.ShapeDtypeStruct((M, D_out), out_dtype),
        grid_spec=pltpu.PrefetchScalarGridSpec(
            num_scalar_prefetch=0,
            grid=grid,
            in_specs=[
                pl.BlockSpec((tm_eff, D_in), lambda m: (m, 0)),
                w_spec,
                b_spec,
            ],
            out_specs=pl.BlockSpec((tm_eff, D_out), lambda m: (m, 0)),
        ),
        compiler_params=pltpu.CompilerParams(
            dimension_semantics=("parallel",),
            vmem_limit_bytes=vmem_limit,
        ),
        cost_estimate=cost,
    )(x2, w_bd, b_cat)
    return out.reshape(B, S, D_out)


if __name__ == "__main__":
    # Small, module-consistent config: windows=2, count of 4 entries ->
    # input_dim = [8, 8] (sum 16), output_dim = [2048, 2048] (sum 4096).
    windows = 2
    count = [3, 5, 2, 6]
    in_dims, out_dims = get_windows_linear(windows, count)

    B, S = 2, 8
    D_in = sum(in_dims)

    key = jax.random.PRNGKey(0)
    keys = jax.random.split(key, 2 * len(in_dims) + 1)
    x = jax.random.normal(keys[0], (B, S, D_in), dtype=jnp.float32)

    # Deterministic synthetic parameters (nn.Linear(s, o): W^T is (s, o), b is (o,)).
    weights, biases = [], []
    for i, (di, do) in enumerate(zip(in_dims, out_dims)):
        w = jax.random.normal(keys[1 + 2 * i], (di, do), dtype=jnp.float32) / jnp.sqrt(
            jnp.float32(di)
        )
        b = 0.01 * jax.random.normal(keys[2 + 2 * i], (1, do), dtype=jnp.float32)
        weights.append(w)
        biases.append(b)

    # Build the fused block-diagonal parameters ONCE (init time), then apply.
    params = build_ve_lower_params(weights, biases, dtype=jnp.float32)
    out = ve_lower_branch_embedding(x, params)
    out = jax.block_until_ready(out)

    # Pure-JAX reference (same block-wise linear + concat semantics as the module).
    offs = [0] + list(accumulate(in_dims))
    ref = jnp.concatenate(
        [
            x[:, :, offs[i]:offs[i + 1]] @ weights[i] + biases[i][0]
            for i in range(len(weights))
        ],
        axis=-1,
    )

    assert out.shape == (B, S, 4096), out.shape
    assert jnp.allclose(out, ref, atol=1e-4, rtol=1e-4)
    print("KERNEL_OK")
</pallas_src>

<mosaic_0001>
module attributes {stable_mosaic.version = 11 : i64} {
  func.func @_ve_lower_kernel(%arg0: i32, %arg1: memref<16x16xf32, #tpu.memory_space<vmem>>, %arg2: memref<16x4096xf32, #tpu.memory_space<vmem>>, %arg3: memref<1x4096xf32, #tpu.memory_space<vmem>>, %arg4: memref<16x4096xf32, #tpu.memory_space<vmem>>) attributes {dimension_semantics = [#tpu.dimension_semantics<parallel>], iteration_bounds = array<i64: 1>, scalar_prefetch = 0 : i64, scratch_operands = 0 : i64, tpu.core_type = #tpu.core_type<tc>, window_params = [{transform_indices = @transform_0, window_bounds = array<i64: 16, 16>}, {pipeline_mode = #tpu.pipeline_mode<synchronous>, transform_indices = @transform_1, window_bounds = array<i64: 16, 4096>}, {pipeline_mode = #tpu.pipeline_mode<synchronous>, transform_indices = @transform_2, window_bounds = array<i64: 1, 4096>}, {transform_indices = @transform_3, window_bounds = array<i64: 16, 4096>}]} {
    %c0 = arith.constant 0 : index
    %c0_0 = arith.constant 0 : index
    %0 = vector.load %arg1[%c0, %c0_0] : memref<16x16xf32, #tpu.memory_space<vmem>>, vector<16x16xf32>
    %c0_1 = arith.constant 0 : index
    %c0_2 = arith.constant 0 : index
    %1 = vector.load %arg2[%c0_1, %c0_2] : memref<16x4096xf32, #tpu.memory_space<vmem>>, vector<16x4096xf32>
    %cst = arith.constant dense<0.000000e+00> : vector<16x4096xf32>
    %2 = tpu.matmul %0, %1, %cst {dimension_numbers = #tpu.dot_dimension_numbers<[1], [0], [0], [1], [0, 0, 1, 1], [], []>} : vector<16x16xf32>, vector<16x4096xf32>, vector<16x4096xf32> -> vector<16x4096xf32>
    %c0_3 = arith.constant 0 : index
    %c0_4 = arith.constant 0 : index
    %3 = vector.load %arg3[%c0_3, %c0_4] : memref<1x4096xf32, #tpu.memory_space<vmem>>, vector<1x4096xf32>
    %4 = vector.broadcast %3 : vector<1x4096xf32> to vector<16x4096xf32>
    %5 = arith.addf %2, %4 : vector<16x4096xf32>
    %c0_5 = arith.constant 0 : index
    %c0_6 = arith.constant 0 : index
    %6 = vector.load %arg4[%c0_5, %c0_6] : memref<16x4096xf32, #tpu.memory_space<vmem>>, vector<16x4096xf32>
    tpu.vector_store %arg4[%c0_5, %c0_6], %5 {strides = array<i32>} : memref<16x4096xf32, #tpu.memory_space<vmem>>, vector<16x4096xf32>,
    return
  }
  func.func @transform_0(%arg0: i32) -> (i32, i32) {
    %c0_i32 = arith.constant 0 : i32
    %c0_i32_0 = arith.constant 0 : i32
    return %arg0, %c0_i32 : i32, i32
  }
  func.func @transform_1(%arg0: i32) -> (i32, i32) {
    %c0_i32 = arith.constant 0 : i32
    %c0_i32_0 = arith.constant 0 : i32
    %c0_i32_1 = arith.constant 0 : i32
    return %c0_i32, %c0_i32_0 : i32, i32
  }
  func.func @transform_2(%arg0: i32) -> (i32, i32) {
    %c0_i32 = arith.constant 0 : i32
    %c0_i32_0 = arith.constant 0 : i32
    %c0_i32_1 = arith.constant 0 : i32
    return %c0_i32, %c0_i32_0 : i32, i32
  }
  func.func @transform_3(%arg0: i32) -> (i32, i32) {
    %c0_i32 = arith.constant 0 : i32
    %c0_i32_0 = arith.constant 0 : i32
    return %arg0, %c0_i32 : i32, i32
  }
}

</mosaic_0001>

<bundles_post_ra>
// kernel: tpu_custom_call.1
= control target key start
LH: loop header
LB: loop body
LE: loop exit
PB: predicated region body
PF: predicated region fallthrough
CT: control target
= control target key end

     0   :  { %8 = vsyncpa [#allocation3], 0  ;;  %s2039_s0 = inlined_call_operand.hbm [shape: f32[16,16], index: 0, kind: input, shape index: {}]   ;;  %s2040_s1 = inlined_call_operand.hbm [shape: f32[16,4096], index: 1, kind: input, shape index: {}]   ;;  %s2041_s2 = inlined_call_operand.hbm [shape: f32[1,4096], index: 2, kind: input, shape index: {}]   ;;  %s2042_s3 = inlined_call_operand.hbm [shape: f32[16,4096], index: 3, kind: output, shape index: {}]  }
   0x1   :  { %9 = vsyncpa [#allocation6], 0 }
   0x2   :  { %10 = vsyncpa [#allocation4], 0  ;;  %s1808_s12 = smov [#allocation5]   ;;  %s1714_s16 = scalar_lea.hbm %s2040_s1, 8192 }
   0x3   :  { %s28_s13 = sshll.u32 %s1808_s12, 4  ;;  %p1715_p0 = scmp.ne.s32.totalorder %s2040_s1, %s1714_s16  ;;  %s29_s13 = int_to_ptr.vmem [resolvable:$true] %s28_s13 }
   0x4   :  { %p1718_p1 = scmp.lt.u32.totalorder %s1714_s16, %s2040_s1 }
   0x6   :  { %p1720_p2 = pnand %p1718_p1, %p1715_p0 }
   0x8   :  { %1723 = shalt.err (!%p1720_p2)
}
   0x9   :  { %s1724_s21 = scalar_lea.vmem %s29_s13, 8192  ;;  %p1729_p4 = scmp.lt.s32.totalorder %s29_s13, %s29_s13 }
   0xa   :  { %p1725_p3 = scmp.ne.s32.totalorder %s29_s13, %s1724_s21  ;;  %p1730_p5 = scmp.lt.s32.totalorder %s1724_s21, %s1724_s21 }
   0xc   :  { %p1731_p6 = por %p1730_p5, %p1729_p4 }
   0xe   :  { %p1732_p7 = pnand %p1731_p6, %p1725_p3 }
  0x10   :  { %1735 = shalt.err (!%p1732_p7)
}
  0x11   :  { %s1809_s22 = smov 4096   ;;  %s1810_s23 = smov 256  }
  0x12   :  { %34 = dma.hbm_to_vmem [thread:$0]  %s2040_s1, 8192, %s29_s13, [#allocation6], %s1809_s22, %s1809_s22, %s1810_s23  }
  0x13   :  { %s1811_s26 = smov [#allocation2]   ;;  %s1736_s30 = scalar_lea.hbm %s2039_s0, 256 }
  0x14   :  { %s16_s27 = sshll.u32 %s1811_s26, 4  ;;  %p1737_p8 = scmp.ne.s32.totalorder %s2039_s0, %s1736_s30  ;;  %s17_s27 = int_to_ptr.vmem [resolvable:$true] %s16_s27 }
  0x15   :  { %p1740_p9 = scmp.lt.u32.totalorder %s1736_s30, %s2039_s0 }
  0x17   :  { %p1742_p10 = pnand %p1740_p9, %p1737_p8 }
  0x19   :  { %1745 = shalt.err (!%p1742_p10)
}
  0x1a   :  { %s1746_s8 = scalar_lea.vmem %s17_s27, 256  ;;  %p1751_p12 = scmp.lt.s32.totalorder %s17_s27, %s17_s27 }
  0x1b   :  { %p1747_p11 = scmp.ne.s32.totalorder %s17_s27, %s1746_s8  ;;  %p1752_p13 = scmp.lt.s32.totalorder %s1746_s8, %s1746_s8 }
  0x1d   :  { %p1753_p0 = por %p1752_p13, %p1751_p12 }
  0x1f   :  { %p1754_p1 = pnand %p1753_p0, %p1747_p11 }
  0x21   :  { %1757 = shalt.err (!%p1754_p1)
}
  0x22   :  { %s1812_s1 = smov 128   ;;  %s1813_s9 = smov 8  }
  0x23   :  { %22 = dma.hbm_to_vmem [thread:$0]  %s2039_s0, 256, %s17_s27, [#allocation3], %s1812_s1, %s1812_s1, %s1813_s9  }
  0x24   :  { %s1814_s12 = smov [#allocation7]   ;;  %s1758_s16 = scalar_lea.hbm %s2041_s2, 512 }
  0x25   :  { %s41_s13 = sshll.u32 %s1814_s12, 4  ;;  %p1759_p2 = scmp.ne.s32.totalorder %s2041_s2, %s1758_s16  ;;  %s42_s13 = int_to_ptr.vmem [resolvable:$true] %s41_s13 }
  0x26   :  { %p1762_p3 = scmp.lt.u32.totalorder %s1758_s16, %s2041_s2 }
  0x28   :  { %p1764_p4 = pnand %p1762_p3, %p1759_p2 }
  0x2a   :  { %1767 = shalt.err (!%p1764_p4)
}
  0x2b   :  { %s1768_s21 = scalar_lea.vmem %s42_s13, 512  ;;  %p1773_p6 = scmp.lt.s32.totalorder %s42_s13, %s42_s13 }
  0x2c   :  { %p1769_p5 = scmp.ne.s32.totalorder %s42_s13, %s1768_s21  ;;  %p1774_p7 = scmp.lt.s32.totalorder %s1768_s21, %s1768_s21 }
  0x2e   :  { %p1775_p8 = por %p1774_p7, %p1773_p6 }
  0x30   :  { %p1776_p9 = pnand %p1775_p8, %p1769_p5 }
  0x32   :  { %1779 = shalt.err (!%p1776_p9)
}
  0x33   :  { %44 = dma.hbm_to_vmem [thread:$0]  %s2041_s2, 512, %s42_s13, [#allocation6]  }
  0x34   :  { %1802 = dma.done.wait [#allocation3], 256  }
  0x35   :  { %1803 = vsyncadd [#allocation3], 4294967040 }
  0x36   :  { %1804 = dma.done.wait [#allocation6], 8704  }
  0x37   :  { %1805 = vsyncadd [#allocation6], 4294958592  ;;  %v1815_v0 = vmov 0.0   ;;  %v57_v1 = vld [vmem:[#allocation5 + $0x8] sm:$0xff]  ;;  %v59_v3 = vld [vmem:[#allocation5 + $0x18] sm:$0xff]  ;;  %vm288_vm0 = vcmask 130048  }
  0x38   :  { %359 = vmatprep.mubr.f32.mxu0 %v1815_v0  ;;  %436 = vmatprep.mubr.f32.mxu1 %v1815_v0  ;;  %v89_v2 = vld [vmem:[#allocation5 + $0x108] sm:$0xff]  ;;  %v91_v5 = vld [vmem:[#allocation5 + $0x118] sm:$0xff]  ;;  %v56_v6 = vld [vmem:[#allocation5] sm:$0xff]  ;;  %s1816_s2 = smov [#allocation8]  }
  0x39   :  { %v1641_v4 = vpack.c.bf16 %v89_v2, %v57_v1  ;;  %v88_v7 = vld [vmem:[#allocation5 + $0x100] sm:$0xff]  ;;  %v1645_v8 = vpack.c.bf16 %v91_v5, %v59_v3  ;;  %v58_v10 = vld [vmem:[#allocation5 + $0x10] sm:$0xff]  ;;  %v61_v14 = vld [vmem:[#allocation5 + $0x28] sm:$0xff]  ;;  %s1596_s25 = sshll.u32 %s1816_s2, 4  ;;  %s1597_s25 = int_to_ptr.vmem [resolvable:$true] %s1596_s25 }
  0x3a   :  { %v1643_v9 = vpack.c.bf16 %v88_v7, %v56_v6  ;;  %v90_v11 = vld [vmem:[#allocation5 + $0x110] sm:$0xff]  ;;  %v93_v15 = vld [vmem:[#allocation5 + $0x128] sm:$0xff]  ;;  %v63_v16 = vld [vmem:[#allocation5 + $0x38] sm:$0xff]  ;;  %s1780_s26 = scalar_lea.vmem %s1597_s25, 8192  ;;  %p1785_p11 = scmp.lt.s32.totalorder %s1597_s25, %s1597_s25 }
  0x3b   :  { %v1878_v12 = vld [vmem:[#allocation2] sm:$0xff]  ;;  %1642 = vmatprep.subr.bf16.mxu0 %v1641_v4  ;;  %v1647_v13 = vpack.c.bf16 %v90_v11, %v58_v10  ;;  %1646 = vmatprep.subr.bf16.mxu1 %v1645_v8  ;;  %v1649_v17 = vpack.c.bf16 %v93_v15, %v61_v14  ;;  %v95_v18 = vld [vmem:[#allocation5 + $0x138] sm:$0xff]  ;;  %v60_v19 = vld [vmem:[#allocation5 + $0x20] sm:$0xff]  ;;  %p1781_p10 = scmp.ne.s32.totalorder %s1597_s25, %s1780_s26  ;;  %p1786_p12 = scmp.lt.s32.totalorder %s1780_s26, %s1780_s26 }
  0x3c   :  { %1644 = vmatpush1.bf16.msra.mxu0 %v1643_v9  ;;  %v92_v20 = vld [vmem:[#allocation5 + $0x120] sm:$0xff]  ;;  %v1653_v21 = vpack.c.bf16 %v95_v18, %v63_v16  ;;  %v62_v23 = vld [vmem:[#allocation5 + $0x30] sm:$0xff]  ;;  %v65_v26 = vld [vmem:[#allocation5 + $0x48] sm:$0xff] }
  0x3d   :  { %1648 = vmatpush1.bf16.msra.mxu1 %v1647_v13  ;;  %v1651_v22 = vpack.c.bf16 %v92_v20, %v60_v19  ;;  %v94_v24 = vld [vmem:[#allocation5 + $0x130] sm:$0xff]  ;;  %1650 = vmatprep.subr.bf16.mxu0 %v1649_v17  ;;  %v97_v27 = vld [vmem:[#allocation5 + $0x148] sm:$0xff]  ;;  %v67_v28 = vld [vmem:[#allocation5 + $0x58] sm:$0xff]  ;;  %p1787_p13 = por %p1786_p12, %p1785_p11 }
  0x3e   :  { %v1655_v25 = vpack.c.bf16 %v94_v24, %v62_v23  ;;  %1654 = vmatprep.subr.bf16.mxu1 %v1653_v21  ;;  %v1657_v29 = vpack.c.bf16 %v97_v27, %v65_v26  ;;  %v99_v30 = vld [vmem:[#allocation5 + $0x158] sm:$0xff]  ;;  %v64_v33 = vld [vmem:[#allocation5 + $0x40] sm:$0xff]  ;;  %v66_v35 = vld [vmem:[#allocation5 + $0x50] sm:$0xff] }
  0x3f   :  { %1609 = vmatmul.mubr.msk.f32.vlgmr.msra.gmra.mrb[0].mxu0 %vm288_vm0, %v1878_v12  ;;  %v1884_v31 = vld [vmem:[#allocation2 + $0x8] sm:$0xff]  ;;  %v1661_v32 = vpack.c.bf16 %v99_v30, %v67_v28  ;;  %v96_v34 = vld [vmem:[#allocation5 + $0x140] sm:$0xff]  ;;  %v98_v36 = vld [vmem:[#allocation5 + $0x150] sm:$0xff]  ;;  %p1788_p0 = pnand %p1787_p13, %p1781_p10 }
  0x40   :  { %1611 = vmatmul.mubr.msk.f32.vlgmr.msra.gmra.mrb[0].mxu1 %vm288_vm0, %v1878_v12  ;;  %1652 = vmatpush1.bf16.msra.mxu0 %v1651_v22  ;;  %v69_v37 = vld [vmem:[#allocation5 + $0x68] sm:$0xff]  ;;  %v1659_v39 = vpack.c.bf16 %v96_v34, %v64_v33  ;;  %v71_v40 = vld [vmem:[#allocation5 + $0x78] sm:$0xff]  ;;  %v1663_v42 = vpack.c.bf16 %v98_v36, %v66_v35  ;;  %v68_v45 = vld [vmem:[#allocation5 + $0x60] sm:$0xff] }
  0x41   :  { %1656 = vmatpush1.bf16.msra.mxu1 %v1655_v25  ;;  %365 = vmatprep.mubr.f32.mxu0 %v1815_v0  ;;  %v101_v38 = vld [vmem:[#allocation5 + $0x168] sm:$0xff]  ;;  %v103_v41 = vld [vmem:[#allocation5 + $0x178] sm:$0xff]  ;;  %v100_v46 = vld [vmem:[#allocation5 + $0x160] sm:$0xff] }
  0x42   :  { %442 = vmatprep.mubr.f32.mxu1 %v1815_v0  ;;  %1658 = vmatprep.subr.bf16.mxu0 %v1657_v29  ;;  %v1665_v43 = vpack.c.bf16 %v101_v38, %v69_v37  ;;  %v1669_v44 = vpack.c.bf16 %v103_v41, %v71_v40  ;;  %v70_v47 = vld [vmem:[#allocation5 + $0x70] sm:$0xff]  ;;  %v73_v49 = vld [vmem:[#allocation5 + $0x88] sm:$0xff]  ;;  %v1667_v51 = vpack.c.bf16 %v100_v46, %v68_v45  ;;  %v75_v52 = vld [vmem:[#allocation5 + $0x98] sm:$0xff]  ;;  %v128_v38 = vlaneseq }
  0x43   :  { %1610 = vmatmul.mubr.msk.f32.gmra.mrb[2].mxu0 %vm288_vm0, %v1884_v31  ;;  %1662 = vmatprep.subr.bf16.mxu1 %v1661_v32  ;;  %v102_v48 = vld [vmem:[#allocation5 + $0x170] sm:$0xff]  ;;  %v105_v50 = vld [vmem:[#allocation5 + $0x188] sm:$0xff]  ;;  %v107_v53 = vld [vmem:[#allocation5 + $0x198] sm:$0xff] }
  0x44   :  { %1612 = vmatmul.mubr.msk.f32.gmra.mrb[2].mxu1 %vm288_vm0, %v1884_v31  ;;  %513 = vmatprep.mubr.f32.mxu0 %v1815_v0  ;;  %v1671_v54 = vpack.c.bf16 %v102_v48, %v70_v47  ;;  %v1673_v55 = vpack.c.bf16 %v105_v50, %v73_v49  ;;  %v1677_v56 = vpack.c.bf16 %v107_v53, %v75_v52  ;;  %v72_v57 = vld [vmem:[#allocation5 + $0x80] sm:$0xff]  ;;  %v74_v59 = vld [vmem:[#allocation5 + $0x90] sm:$0xff]  ;;  %v77_v61 = vld [vmem:[#allocation5 + $0xa8] sm:$0xff] }
  0x45   :  { %590 = vmatprep.mubr.f32.mxu1 %v1815_v0  ;;  %v104_v58 = vld [vmem:[#allocation5 + $0x180] sm:$0xff]  ;;  %v106_v60 = vld [vmem:[#allocation5 + $0x190] sm:$0xff]  ;;  %v109_v62 = vld [vmem:[#allocation5 + $0x1a8] sm:$0xff] }
  0x46   :  { %v1675_v63 = vpack.c.bf16 %v104_v58, %v72_v57  ;;  %v79_v1 = vld [vmem:[#allocation5 + $0xb8] sm:$0xff]  ;;  %v1679_v3 = vpack.c.bf16 %v106_v60, %v74_v59  ;;  %v1681_v4 = vpack.c.bf16 %v109_v62, %v77_v61  ;;  %v76_v6 = vld [vmem:[#allocation5 + $0xa0] sm:$0xff]  ;;  %v78_v8 = vld [vmem:[#allocation5 + $0xb0] sm:$0xff] }
  0x47   :  { %1613 = vmatmul.mubr.msk.f32.vlgmr.msra.gmra.mrb[4].mxu0 %vm288_vm0, %v1878_v12  ;;  %v111_v2 = vld [vmem:[#allocation5 + $0x1b8] sm:$0xff]  ;;  %v108_v7 = vld [vmem:[#allocation5 + $0x1a0] sm:$0xff]  ;;  %v110_v9 = vld [vmem:[#allocation5 + $0x1b0] sm:$0xff] }
  0x48   :  { %1615 = vmatmul.mubr.msk.f32.vlgmr.msra.gmra.mrb[4].mxu1 %vm288_vm0, %v1878_v12  ;;  %1660 = vmatpush1.bf16.msra.mxu0 %v1659_v39  ;;  %v1685_v5 = vpack.c.bf16 %v111_v2, %v79_v1  ;;  %v81_v10 = vld [vmem:[#allocation5 + $0xc8] sm:$0xff]  ;;  %v1683_v13 = vpack.c.bf16 %v108_v7, %v76_v6  ;;  %v83_v14 = vld [vmem:[#allocation5 + $0xd8] sm:$0xff]  ;;  %v1687_v16 = vpack.c.bf16 %v110_v9, %v78_v8  ;;  %v80_v19 = vld [vmem:[#allocation5 + $0xc0] sm:$0xff]  ;;  %v129_v39 = vshrl.u32 %v128_v38, 7 }
  0x49   :  { %1664 = vmatpush1.bf16.msra.mxu1 %v1663_v42  ;;  %519 = vmatprep.mubr.f32.mxu0 %v1815_v0  ;;  %v113_v11 = vld [vmem:[#allocation5 + $0x1c8] sm:$0xff]  ;;  %v115_v15 = vld [vmem:[#allocation5 + $0x1d8] sm:$0xff]  ;;  %v112_v20 = vld [vmem:[#allocation5 + $0x1c0] sm:$0xff] }
  0x4a   :  { %596 = vmatprep.mubr.f32.mxu1 %v1815_v0  ;;  %1666 = vmatprep.subr.bf16.mxu0 %v1665_v43  ;;  %v1689_v17 = vpack.c.bf16 %v113_v11, %v81_v10  ;;  %v1693_v18 = vpack.c.bf16 %v115_v15, %v83_v14  ;;  %v82_v21 = vld [vmem:[#allocation5 + $0xd0] sm:$0xff]  ;;  %v85_v23 = vld [vmem:[#allocation5 + $0xe8] sm:$0xff]  ;;  %v1691_v25 = vpack.c.bf16 %v112_v20, %v80_v19  ;;  %v87_v26 = vld [vmem:[#allocation5 + $0xf8] sm:$0xff]  ;;  %v1976_v40 = vsub.s32 0, %v129_v39 }
  0x4b   :  { %1614 = vmatmul.mubr.msk.f32.gmra.mrb[6].mxu0 %vm288_vm0, %v1884_v31  ;;  %1670 = vmatprep.subr.bf16.mxu1 %v1669_v44  ;;  %v114_v22 = vld [vmem:[#allocation5 + $0x1d0] sm:$0xff]  ;;  %v117_v24 = vld [vmem:[#allocation5 + $0x1e8] sm:$0xff]  ;;  %v119_v27 = vld [vmem:[#allocation5 + $0x1f8] sm:$0xff]  ;;  %v1978_v42 = vsub.s32 2, %v129_v39  ;;  %v1980_v43 = vsub.s32 1, %v129_v39  ;;  %v1988_v50 = vsub.s32 4, %v129_v39 }
  0x4c   :  { %1616 = vmatmul.mubr.msk.f32.gmra.mrb[6].mxu1 %vm288_vm0, %v1884_v31  ;;  %667 = vmatprep.mubr.f32.mxu0 %v1815_v0  ;;  %v1695_v28 = vpack.c.bf16 %v114_v22, %v82_v21  ;;  %v1697_v29 = vpack.c.bf16 %v117_v24, %v85_v23  ;;  %v1701_v30 = vpack.c.bf16 %v119_v27, %v87_v26  ;;  %v84_v32 = vld [vmem:[#allocation5 + $0xe0] sm:$0xff]  ;;  %v86_v34 = vld [vmem:[#allocation5 + $0xf0] sm:$0xff]  ;;  %v1994_v57 = vsub.s32 7, %v129_v39  ;;  %v121_v15 = vld [vmem:[#allocation7 + $0x8] sm:$0xff] }
  0x4d   :  { %744 = vmatprep.mubr.f32.mxu1 %v1815_v0  ;;  %v116_v33 = vld [vmem:[#allocation5 + $0x1e0] sm:$0xff]  ;;  %v118_v35 = vld [vmem:[#allocation5 + $0x1f0] sm:$0xff]  ;;  %v163_v21 = vrot.slane %v121_v15, %v1976_v40  ;;  %v167_v26 = vrot.slane %v121_v15, %v1980_v43 }
  0x4e   :  { %v1699_v36 = vpack.c.bf16 %v116_v33, %v84_v32  ;;  %v1703_v37 = vpack.c.bf16 %v118_v35, %v86_v34  ;;  %v120_v41 = vld [vmem:[#allocation7] sm:$0xff] }
  0x4f   :  { %1617 = vmatmul.mubr.msk.f32.vlgmr.msra.gmra.mrb[8].mxu0 %vm288_vm0, %v1878_v12  ;;  %v131_v44 = vrot.slane %v120_v41, %v1976_v40  ;;  %v135_v45 = vrot.slane %v120_v41, %v1980_v43  ;;  %v147_v62 = vrot.slane %v120_v41, %v1988_v50  ;;  %v159_v6 = vrot.slane %v120_v41, %v1994_v57 }
  0x50   :  { %1619 = vmatmul.mubr.msk.f32.vlgmr.msra.gmra.mrb[8].mxu1 %vm288_vm0, %v1878_v12  ;;  %1668 = vmatpush1.bf16.msra.mxu0 %v1667_v51 }
  0x51   :  { %1672 = vmatpush1.bf16.msra.mxu1 %v1671_v54  ;;  %673 = vmatprep.mubr.f32.mxu0 %v1815_v0  ;;  %v1990_v54 = vsub.s32 6, %v129_v39 }
  0x52   :  { %750 = vmatprep.mubr.f32.mxu1 %v1815_v0  ;;  %1674 = vmatprep.subr.bf16.mxu0 %v1673_v55  ;;  %v1992_v55 = vsub.s32 5, %v129_v39 }
  0x53   :  { %1618 = vmatmul.mubr.msk.f32.gmra.mrb[10].mxu0 %vm288_vm0, %v1884_v31  ;;  %1678 = vmatprep.subr.bf16.mxu1 %v1677_v56 }
  0x54   :  { %1620 = vmatmul.mubr.msk.f32.gmra.mrb[10].mxu1 %vm288_vm0, %v1884_v31  ;;  %821 = vmatprep.mubr.f32.mxu0 %v1815_v0 }
  0x55   :  { %898 = vmatprep.mubr.f32.mxu1 %v1815_v0 }
  0x57   :  { %1621 = vmatmul.mubr.msk.f32.vlgmr.msra.gmra.mrb[12].mxu0 %vm288_vm0, %v1878_v12 }
  0x58   :  { %1623 = vmatmul.mubr.msk.f32.vlgmr.msra.gmra.mrb[12].mxu1 %vm288_vm0, %v1878_v12  ;;  %1676 = vmatpush1.bf16.msra.mxu0 %v1675_v63 }
  0x59   :  { %1680 = vmatpush1.bf16.msra.mxu1 %v1679_v3  ;;  %827 = vmatprep.mubr.f32.mxu0 %v1815_v0  ;;  %v155_v3 = vrot.slane %v120_v41, %v1990_v54 }
  0x5a   :  { %904 = vmatprep.mubr.f32.mxu1 %v1815_v0  ;;  %1682 = vmatprep.subr.bf16.mxu0 %v1681_v4  ;;  %v151_v4 = vrot.slane %v120_v41, %v1992_v55 }
  0x5b   :  { %1622 = vmatmul.mubr.msk.f32.gmra.mrb[14].mxu0 %vm288_vm0, %v1884_v31  ;;  %1686 = vmatprep.subr.bf16.mxu1 %v1685_v5 }
  0x5c   :  { %1624 = vmatmul.mubr.msk.f32.gmra.mrb[14].mxu1 %vm288_vm0, %v1884_v31  ;;  %975 = vmatprep.mubr.f32.mxu0 %v1815_v0 }
  0x5d   :  { %1052 = vmatprep.mubr.f32.mxu1 %v1815_v0 }
  0x5f   :  { %1625 = vmatmul.mubr.msk.f32.vlgmr.msra.gmra.mrb[16].mxu0 %vm288_vm0, %v1878_v12 }
  0x60   :  { %1627 = vmatmul.mubr.msk.f32.vlgmr.msra.gmra.mrb[16].mxu1 %vm288_vm0, %v1878_v12  ;;  %1684 = vmatpush1.bf16.msra.mxu0 %v1683_v13 }
  0x61   :  { %1688 = vmatpush1.bf16.msra.mxu1 %v1687_v16  ;;  %981 = vmatprep.mubr.f32.mxu0 %v1815_v0 }
  0x62   :  { %1058 = vmatprep.mubr.f32.mxu1 %v1815_v0  ;;  %1690 = vmatprep.subr.bf16.mxu0 %v1689_v17 }
  0x63   :  { %1626 = vmatmul.mubr.msk.f32.gmra.mrb[18].mxu0 %vm288_vm0, %v1884_v31  ;;  %1694 = vmatprep.subr.bf16.mxu1 %v1693_v18 }
  0x64   :  { %1628 = vmatmul.mubr.msk.f32.gmra.mrb[18].mxu1 %vm288_vm0, %v1884_v31  ;;  %1129 = vmatprep.mubr.f32.mxu0 %v1815_v0 }
  0x65   :  { %1206 = vmatprep.mubr.f32.mxu1 %v1815_v0 }
  0x67   :  { %1629 = vmatmul.mubr.msk.f32.vlgmr.msra.gmra.mrb[20].mxu0 %vm288_vm0, %v1878_v12 }
  0x68   :  { %1631 = vmatmul.mubr.msk.f32.vlgmr.msra.gmra.mrb[20].mxu1 %vm288_vm0, %v1878_v12  ;;  %1692 = vmatpush1.bf16.msra.mxu0 %v1691_v25  ;;  %v171_v25 = vrot.slane %v121_v15, %v1978_v42 }
  0x69   :  { %1696 = vmatpush1.bf16.msra.mxu1 %v1695_v28  ;;  %1135 = vmatprep.mubr.f32.mxu0 %v1815_v0 }
  0x6a   :  { %1212 = vmatprep.mubr.f32.mxu1 %v1815_v0  ;;  %1698 = vmatprep.subr.bf16.mxu0 %v1697_v29 }
  0x6b   :  { %1630 = vmatmul.mubr.msk.f32.gmra.mrb[22].mxu0 %vm288_vm0, %v1884_v31  ;;  %1702 = vmatprep.subr.bf16.mxu1 %v1701_v30 }
  0x6c   :  { %1632 = vmatmul.mubr.msk.f32.gmra.mrb[22].mxu1 %vm288_vm0, %v1884_v31  ;;  %1283 = vmatprep.mubr.f32.mxu0 %v1815_v0 }
  0x6d   :  { %1360 = vmatprep.mubr.f32.mxu1 %v1815_v0 }
  0x6f   :  { %1633 = vmatmul.mubr.msk.f32.vlgmr.msra.gmra.mrb[24].mxu0 %vm288_vm0, %v1878_v12 }
  0x70   :  { %1635 = vmatmul.mubr.msk.f32.vlgmr.msra.gmra.mrb[24].mxu1 %vm288_vm0, %v1878_v12  ;;  %1700 = vmatpush1.bf16.msra.mxu0 %v1699_v36 }
  0x71   :  { %1704 = vmatpush1.bf16.msra.mxu1 %v1703_v37  ;;  %1289 = vmatprep.mubr.f32.mxu0 %v1815_v0 }
  0x72   :  { %1366 = vmatprep.mubr.f32.mxu1 %v1815_v0 }
  0x73   :  { %1634 = vmatmul.mubr.msk.f32.gmra.mrb[26].mxu0 %vm288_vm0, %v1884_v31 }
  0x74   :  { %1636 = vmatmul.mubr.msk.f32.gmra.mrb[26].mxu1 %vm288_vm0, %v1884_v31  ;;  %1437 = vmatprep.mubr.f32.mxu0 %v1815_v0 }
  0x75   :  { %1514 = vmatprep.mubr.f32.mxu1 %v1815_v0 }
  0x77   :  { %1637 = vmatmul.mubr.msk.f32.vlgmr.msra.gmra.mrb[28].mxu0 %vm288_vm0, %v1878_v12 }
  0x78   :  { %1639 = vmatmul.mubr.msk.f32.vlgmr.msra.gmra.mrb[28].mxu1 %vm288_vm0, %v1878_v12  ;;  %1443 = vmatprep.mubr.f32.mxu0 %v1815_v0  ;;  %v1982_v12 = vsub.s32 3, %v129_v39 }
  0x79   :  { %1520 = vmatprep.mubr.f32.mxu1 %v1815_v0  ;;  %v139_v0 = vrot.slane %v120_v41, %v1978_v42 }
  0x7a   :  { %v143_v46 = vrot.slane %v120_v41, %v1982_v12  ;;  %v175_v28 = vrot.slane %v121_v15, %v1982_v12 }
  0x7b   :  { %1638 = vmatmul.mubr.msk.f32.gmra.mrb[30].mxu0 %vm288_vm0, %v1884_v31 }
  0x7c   :  { %1640 = vmatmul.mubr.msk.f32.gmra.mrb[30].mxu1 %vm288_vm0, %v1884_v31 }
 0x112   :  { %v361_v31 = vpop.f32.mrb[0].mxu0 }
 0x113   :  { %v362_v47 = vadd.f32 %v361_v31, %v131_v44  ;;  %v438_v48 = vpop.f32.mrb[0].mxu1  ;;  %v363_v49 = vpop.f32.mrb[1].mxu0 }
 0x114   :  { %v439_v51 = vadd.f32 %v438_v48, %v139_v0  ;;  %v364_v52 = vadd.f32 %v363_v49, %v135_v45  ;;  %v440_v53 = vpop.f32.mrb[1].mxu1  ;;  %v183_v48 = vrot.slane %v121_v15, %v1992_v55 }
 0x115   :  { %1527 = vst [vmem:[#allocation8] sm:$0xff] %v362_v47  ;;  %v441_v56 = vadd.f32 %v440_v53, %v143_v46  ;;  %v187_v47 = vrot.slane %v121_v15, %v1990_v54 }
 0x116   :  { %1529 = vst [vmem:[#allocation8 + $0x10] sm:$0xff] %v439_v51  ;;  %1528 = vst [vmem:[#allocation8 + $0x8] sm:$0xff] %v364_v52  ;;  %v367_v58 = vpop.f32.mrb[2].mxu0  ;;  %v191_v51 = vrot.slane %v121_v15, %v1994_v57 }
 0x117   :  { %1530 = vst [vmem:[#allocation8 + $0x18] sm:$0xff] %v441_v56  ;;  %v368_v59 = vadd.f32 %v367_v58, %v131_v44  ;;  %v444_v60 = vpop.f32.mrb[2].mxu1  ;;  %v369_v61 = vpop.f32.mrb[3].mxu0 }
 0x118   :  { %v445_v63 = vadd.f32 %v444_v60, %v139_v0  ;;  %v370_v1 = vadd.f32 %v369_v61, %v135_v45  ;;  %v446_v2 = vpop.f32.mrb[3].mxu1  ;;  %v179_v0 = vrot.slane %v121_v15, %v1988_v50 }
 0x119   :  { %1559 = vst [vmem:[#allocation8 + $0x100] sm:$0xff] %v368_v59  ;;  %v447_v5 = vadd.f32 %v446_v2, %v143_v46 }
 0x11a   :  { %1561 = vst [vmem:[#allocation8 + $0x110] sm:$0xff] %v445_v63  ;;  %1560 = vst [vmem:[#allocation8 + $0x108] sm:$0xff] %v370_v1  ;;  %v515_v7 = vpop.f32.mrb[4].mxu0 }
 0x11b   :  { %1562 = vst [vmem:[#allocation8 + $0x118] sm:$0xff] %v447_v5  ;;  %v516_v8 = vadd.f32 %v515_v7, %v147_v62  ;;  %v592_v9 = vpop.f32.mrb[4].mxu1  ;;  %v517_v10 = vpop.f32.mrb[5].mxu0 }
 0x11c   :  { %v593_v11 = vadd.f32 %v592_v9, %v155_v3  ;;  %v518_v13 = vadd.f32 %v517_v10, %v151_v4  ;;  %v594_v14 = vpop.f32.mrb[5].mxu1 }
 0x11d   :  { %1531 = vst [vmem:[#allocation8 + $0x20] sm:$0xff] %v516_v8  ;;  %v595_v16 = vadd.f32 %v594_v14, %v159_v6 }
 0x11e   :  { %1533 = vst [vmem:[#allocation8 + $0x30] sm:$0xff] %v593_v11  ;;  %1532 = vst [vmem:[#allocation8 + $0x28] sm:$0xff] %v518_v13  ;;  %v521_v17 = vpop.f32.mrb[6].mxu0 }
 0x11f   :  { %1534 = vst [vmem:[#allocation8 + $0x38] sm:$0xff] %v595_v16  ;;  %v522_v18 = vadd.f32 %v521_v17, %v147_v62  ;;  %v598_v19 = vpop.f32.mrb[6].mxu1  ;;  %v523_v20 = vpop.f32.mrb[7].mxu0  ;;  %v122_v62 = vld [vmem:[#allocation7 + $0x10] sm:$0xff] }
 0x120   :  { %v599_v22 = vadd.f32 %v598_v19, %v155_v3  ;;  %v524_v23 = vadd.f32 %v523_v20, %v151_v4  ;;  %v600_v24 = vpop.f32.mrb[7].mxu1  ;;  %v195_v5 = vrot.slane %v122_v62, %v1976_v40  ;;  %v203_v9 = vrot.slane %v122_v62, %v1978_v42 }
 0x121   :  { %1563 = vst [vmem:[#allocation8 + $0x120] sm:$0xff] %v522_v18  ;;  %v601_v27 = vadd.f32 %v600_v24, %v159_v6  ;;  %v199_v10 = vrot.slane %v122_v62, %v1980_v43  ;;  %v207_v13 = vrot.slane %v122_v62, %v1982_v12 }
 0x122   :  { %1565 = vst [vmem:[#allocation8 + $0x130] sm:$0xff] %v599_v22  ;;  %1564 = vst [vmem:[#allocation8 + $0x128] sm:$0xff] %v524_v23  ;;  %v669_v29 = vpop.f32.mrb[8].mxu0 }
 0x123   :  { %1566 = vst [vmem:[#allocation8 + $0x138] sm:$0xff] %v601_v27  ;;  %v670_v30 = vadd.f32 %v669_v29, %v163_v21  ;;  %v746_v32 = vpop.f32.mrb[8].mxu1  ;;  %v671_v33 = vpop.f32.mrb[9].mxu0 }
 0x124   :  { %v747_v34 = vadd.f32 %v746_v32, %v171_v25  ;;  %v672_v35 = vadd.f32 %v671_v33, %v167_v26  ;;  %v748_v36 = vpop.f32.mrb[9].mxu1  ;;  %v215_v32 = vrot.slane %v122_v62, %v1992_v55 }
 0x125   :  { %1535 = vst [vmem:[#allocation8 + $0x40] sm:$0xff] %v670_v30  ;;  %v749_v37 = vadd.f32 %v748_v36, %v175_v28  ;;  %v219_v30 = vrot.slane %v122_v62, %v1990_v54 }
 0x126   :  { %1537 = vst [vmem:[#allocation8 + $0x50] sm:$0xff] %v747_v34  ;;  %1536 = vst [vmem:[#allocation8 + $0x48] sm:$0xff] %v672_v35  ;;  %v675_v38 = vpop.f32.mrb[10].mxu0  ;;  %v223_v34 = vrot.slane %v122_v62, %v1994_v57 }
 0x127   :  { %1538 = vst [vmem:[#allocation8 + $0x58] sm:$0xff] %v749_v37  ;;  %v676_v39 = vadd.f32 %v675_v38, %v163_v21  ;;  %v752_v41 = vpop.f32.mrb[10].mxu1  ;;  %v677_v44 = vpop.f32.mrb[11].mxu0 }
 0x128   :  { %v753_v45 = vadd.f32 %v752_v41, %v171_v25  ;;  %v678_v46 = vadd.f32 %v677_v44, %v167_v26  ;;  %v754_v31 = vpop.f32.mrb[11].mxu1  ;;  %v211_v26 = vrot.slane %v122_v62, %v1988_v50 }
 0x129   :  { %1567 = vst [vmem:[#allocation8 + $0x140] sm:$0xff] %v676_v39  ;;  %v755_v49 = vadd.f32 %v754_v31, %v175_v28 }
 0x12a   :  { %1569 = vst [vmem:[#allocation8 + $0x150] sm:$0xff] %v753_v45  ;;  %1568 = vst [vmem:[#allocation8 + $0x148] sm:$0xff] %v678_v46  ;;  %v823_v52 = vpop.f32.mrb[12].mxu0 }
 0x12b   :  { %1570 = vst [vmem:[#allocation8 + $0x158] sm:$0xff] %v755_v49  ;;  %v824_v53 = vadd.f32 %v823_v52, %v179_v0  ;;  %v900_v56 = vpop.f32.mrb[12].mxu1  ;;  %v825_v58 = vpop.f32.mrb[13].mxu0 }
 0x12c   :  { %v901_v59 = vadd.f32 %v900_v56, %v187_v47  ;;  %v826_v60 = vadd.f32 %v825_v58, %v183_v48  ;;  %v902_v61 = vpop.f32.mrb[13].mxu1 }
 0x12d   :  { %1539 = vst [vmem:[#allocation8 + $0x60] sm:$0xff] %v824_v53  ;;  %v903_v63 = vadd.f32 %v902_v61, %v191_v51 }
 0x12e   :  { %1541 = vst [vmem:[#allocation8 + $0x70] sm:$0xff] %v901_v59  ;;  %1540 = vst [vmem:[#allocation8 + $0x68] sm:$0xff] %v826_v60  ;;  %v829_v1 = vpop.f32.mrb[14].mxu0 }
 0x12f   :  { %1542 = vst [vmem:[#allocation8 + $0x78] sm:$0xff] %v903_v63  ;;  %v830_v2 = vadd.f32 %v829_v1, %v179_v0  ;;  %v906_v3 = vpop.f32.mrb[14].mxu1  ;;  %v831_v4 = vpop.f32.mrb[15].mxu0  ;;  %v123_v0 = vld [vmem:[#allocation7 + $0x18] sm:$0xff] }
 0x130   :  { %v907_v6 = vadd.f32 %v906_v3, %v187_v47  ;;  %v832_v7 = vadd.f32 %v831_v4, %v183_v48  ;;  %v908_v8 = vpop.f32.mrb[15].mxu1  ;;  %v227_v49 = vrot.slane %v123_v0, %v1976_v40  ;;  %v235_v56 = vrot.slane %v123_v0, %v1978_v42 }
 0x131   :  { %1571 = vst [vmem:[#allocation8 + $0x160] sm:$0xff] %v830_v2  ;;  %v909_v11 = vadd.f32 %v908_v8, %v191_v51  ;;  %v231_v58 = vrot.slane %v123_v0, %v1980_v43  ;;  %v239_v60 = vrot.slane %v123_v0, %v1982_v12  ;;  %v243_v12 = vrot.slane %v123_v0, %v1988_v50 }
 0x132   :  { %1573 = vst [vmem:[#allocation8 + $0x170] sm:$0xff] %v907_v6  ;;  %1572 = vst [vmem:[#allocation8 + $0x168] sm:$0xff] %v832_v7  ;;  %v977_v14 = vpop.f32.mrb[16].mxu0 }
 0x133   :  { %1574 = vst [vmem:[#allocation8 + $0x178] sm:$0xff] %v909_v11  ;;  %v978_v15 = vadd.f32 %v977_v14, %v195_v5  ;;  %v1054_v16 = vpop.f32.mrb[16].mxu1  ;;  %v979_v17 = vpop.f32.mrb[17].mxu0  ;;  %v247_v11 = vrot.slane %v123_v0, %v1992_v55  ;;  %v255_v14 = vrot.slane %v123_v0, %v1994_v57 }
 0x134   :  { %v1055_v18 = vadd.f32 %v1054_v16, %v203_v9  ;;  %v980_v19 = vadd.f32 %v979_v17, %v199_v10  ;;  %v1056_v20 = vpop.f32.mrb[17].mxu1 }
 0x135   :  { %1543 = vst [vmem:[#allocation8 + $0x80] sm:$0xff] %v978_v15  ;;  %v1057_v21 = vadd.f32 %v1056_v20, %v207_v13 }
 0x136   :  { %1545 = vst [vmem:[#allocation8 + $0x90] sm:$0xff] %v1055_v18  ;;  %1544 = vst [vmem:[#allocation8 + $0x88] sm:$0xff] %v980_v19  ;;  %v983_v22 = vpop.f32.mrb[18].mxu0 }
 0x137   :  { %1546 = vst [vmem:[#allocation8 + $0x98] sm:$0xff] %v1057_v21  ;;  %v984_v23 = vadd.f32 %v983_v22, %v195_v5  ;;  %v1060_v24 = vpop.f32.mrb[18].mxu1  ;;  %v985_v25 = vpop.f32.mrb[19].mxu0 }
 0x138   :  { %v1061_v27 = vadd.f32 %v1060_v24, %v203_v9  ;;  %v986_v28 = vadd.f32 %v985_v25, %v199_v10  ;;  %v1062_v29 = vpop.f32.mrb[19].mxu1  ;;  %v251_v10 = vrot.slane %v123_v0, %v1990_v54 }
 0x139   :  { %1575 = vst [vmem:[#allocation8 + $0x180] sm:$0xff] %v984_v23  ;;  %v1063_v33 = vadd.f32 %v1062_v29, %v207_v13 }
 0x13a   :  { %1577 = vst [vmem:[#allocation8 + $0x190] sm:$0xff] %v1061_v27  ;;  %1576 = vst [vmem:[#allocation8 + $0x188] sm:$0xff] %v986_v28  ;;  %v1131_v35 = vpop.f32.mrb[20].mxu0 }
 0x13b   :  { %1578 = vst [vmem:[#allocation8 + $0x198] sm:$0xff] %v1063_v33  ;;  %v1132_v36 = vadd.f32 %v1131_v35, %v211_v26  ;;  %v1208_v37 = vpop.f32.mrb[20].mxu1  ;;  %v1133_v38 = vpop.f32.mrb[21].mxu0 }
 0x13c   :  { %v1209_v39 = vadd.f32 %v1208_v37, %v219_v30  ;;  %v1134_v41 = vadd.f32 %v1133_v38, %v215_v32  ;;  %v1210_v44 = vpop.f32.mrb[21].mxu1 }
 0x13d   :  { %1547 = vst [vmem:[#allocation8 + $0xa0] sm:$0xff] %v1132_v36  ;;  %v1211_v45 = vadd.f32 %v1210_v44, %v223_v34 }
 0x13e   :  { %1549 = vst [vmem:[#allocation8 + $0xb0] sm:$0xff] %v1209_v39  ;;  %1548 = vst [vmem:[#allocation8 + $0xa8] sm:$0xff] %v1134_v41  ;;  %v1137_v46 = vpop.f32.mrb[22].mxu0 }
 0x13f   :  { %1550 = vst [vmem:[#allocation8 + $0xb8] sm:$0xff] %v1211_v45  ;;  %v1138_v31 = vadd.f32 %v1137_v46, %v211_v26  ;;  %v1214_v47 = vpop.f32.mrb[22].mxu1  ;;  %v1139_v48 = vpop.f32.mrb[23].mxu0 }
 0x140   :  { %v1215_v51 = vadd.f32 %v1214_v47, %v219_v30  ;;  %v1140_v52 = vadd.f32 %v1139_v48, %v215_v32  ;;  %v1216_v53 = vpop.f32.mrb[23].mxu1 }
 0x141   :  { %1579 = vst [vmem:[#allocation8 + $0x1a0] sm:$0xff] %v1138_v31  ;;  %v1217_v59 = vadd.f32 %v1216_v53, %v223_v34 }
 0x142   :  { %1581 = vst [vmem:[#allocation8 + $0x1b0] sm:$0xff] %v1215_v51  ;;  %1580 = vst [vmem:[#allocation8 + $0x1a8] sm:$0xff] %v1140_v52  ;;  %v1285_v61 = vpop.f32.mrb[24].mxu0 }
 0x143   :  { %1582 = vst [vmem:[#allocation8 + $0x1b8] sm:$0xff] %v1217_v59  ;;  %v1286_v62 = vadd.f32 %v1285_v61, %v227_v49  ;;  %v1362_v63 = vpop.f32.mrb[24].mxu1  ;;  %v1287_v1 = vpop.f32.mrb[25].mxu0 }
 0x144   :  { %v1363_v2 = vadd.f32 %v1362_v63, %v235_v56  ;;  %v1288_v40 = vadd.f32 %v1287_v1, %v231_v58  ;;  %v1364_v3 = vpop.f32.mrb[25].mxu1 }
 0x145   :  { %1551 = vst [vmem:[#allocation8 + $0xc0] sm:$0xff] %v1286_v62  ;;  %v1365_v4 = vadd.f32 %v1364_v3, %v239_v60 }
 0x146   :  { %1553 = vst [vmem:[#allocation8 + $0xd0] sm:$0xff] %v1363_v2  ;;  %1552 = vst [vmem:[#allocation8 + $0xc8] sm:$0xff] %v1288_v40  ;;  %v1291_v42 = vpop.f32.mrb[26].mxu0 }
 0x147   :  { %1554 = vst [vmem:[#allocation8 + $0xd8] sm:$0xff] %v1365_v4  ;;  %v1292_v43 = vadd.f32 %v1291_v42, %v227_v49  ;;  %v1368_v5 = vpop.f32.mrb[26].mxu1  ;;  %v1293_v6 = vpop.f32.mrb[27].mxu0 }
 0x148   :  { %v1369_v7 = vadd.f32 %v1368_v5, %v235_v56  ;;  %v1294_v8 = vadd.f32 %v1293_v6, %v231_v58  ;;  %v1370_v9 = vpop.f32.mrb[27].mxu1 }
 0x149   :  { %1583 = vst [vmem:[#allocation8 + $0x1c0] sm:$0xff] %v1292_v43  ;;  %v1371_v13 = vadd.f32 %v1370_v9, %v239_v60 }
 0x14a   :  { %1585 = vst [vmem:[#allocation8 + $0x1d0] sm:$0xff] %v1369_v7  ;;  %1584 = vst [vmem:[#allocation8 + $0x1c8] sm:$0xff] %v1294_v8  ;;  %v1439_v15 = vpop.f32.mrb[28].mxu0 }
 0x14b   :  { %1586 = vst [vmem:[#allocation8 + $0x1d8] sm:$0xff] %v1371_v13  ;;  %v1440_v16 = vadd.f32 %v1439_v15, %v243_v12  ;;  %v1516_v17 = vpop.f32.mrb[28].mxu1  ;;  %v1441_v18 = vpop.f32.mrb[29].mxu0 }
 0x14c   :  { %v1517_v19 = vadd.f32 %v1516_v17, %v251_v10  ;;  %v1442_v50 = vadd.f32 %v1441_v18, %v247_v11  ;;  %v1518_v20 = vpop.f32.mrb[29].mxu1 }
 0x14d   :  { %1555 = vst [vmem:[#allocation8 + $0xe0] sm:$0xff] %v1440_v16  ;;  %v1519_v21 = vadd.f32 %v1518_v20, %v255_v14 }
 0x14e   :  { %1557 = vst [vmem:[#allocation8 + $0xf0] sm:$0xff] %v1517_v19  ;;  %1556 = vst [vmem:[#allocation8 + $0xe8] sm:$0xff] %v1442_v50  ;;  %v1445_v54 = vpop.f32.mrb[30].mxu0 }
 0x14f   :  { %1558 = vst [vmem:[#allocation8 + $0xf8] sm:$0xff] %v1519_v21  ;;  %v1446_v55 = vadd.f32 %v1445_v54, %v243_v12  ;;  %v1522_v57 = vpop.f32.mrb[30].mxu1  ;;  %v1447_v22 = vpop.f32.mrb[31].mxu0 }
 0x150   :  { %v1523_v23 = vadd.f32 %v1522_v57, %v251_v10  ;;  %v1448_v24 = vadd.f32 %v1447_v22, %v247_v11  ;;  %v1524_v25 = vpop.f32.mrb[31].mxu1 }
 0x151   :  { %1587 = vst [vmem:[#allocation8 + $0x1e0] sm:$0xff] %v1446_v55  ;;  %v1525_v26 = vadd.f32 %v1524_v25, %v255_v14 }
 0x152   :  { %1589 = vst [vmem:[#allocation8 + $0x1f0] sm:$0xff] %v1523_v23  ;;  %1588 = vst [vmem:[#allocation8 + $0x1e8] sm:$0xff] %v1448_v24 }
 0x153   :  { %1590 = vst [vmem:[#allocation8 + $0x1f8] sm:$0xff] %v1525_v26 }
 0x154   :  { %1791 = shalt.err (!%p1788_p0)
}
 0x155   :  { %s1792_s29 = scalar_lea.hbm %s2042_s3, 8192 }
 0x156   :  { %p1793_p1 = scmp.ne.s32.totalorder %s2042_s3, %s1792_s29  ;;  %p1796_p2 = scmp.lt.u32.totalorder %s1792_s29, %s2042_s3 }
 0x158   :  { %p1798_p3 = pnand %p1796_p2, %p1793_p1 }
 0x15a   :  { %1801 = shalt.err (!%p1798_p3)
}
 0x15b   :  { %1602 = dma.vmem_to_hbm [thread:$0]  %s1597_s25, 8192, %s2042_s3, [#allocation4], %s1809_s22, %s1809_s22, %s1810_s23  }
 0x15c   :  { %1806 = dma.done.wait [#allocation4], 8192  }
 0x15d   :  { %1807 = vsyncadd [#allocation4], 4294959104 }
 0x15e   :  { %1606 = vsyncpa [#allocation3], 1 }
 0x15f   :  { %1607 = vsyncpa [#allocation6], 1 }
 0x160   :  { %1608 = vsyncpa [#allocation4], 1 }

</bundles_post_ra>
